<compile_context>
chip_gen: v7x
topology: tpu7x:2x2x1
jax: 0.10.0
libtpu: 0.0.40
codegen_flags: <defaults>
</compile_context>

<pallas_src>
import functools
import re

import jax
import jax.numpy as jnp
from jax.experimental import pallas as pl
from jax.experimental.pallas import tpu as pltpu

_MIB = 1024 * 1024


def _round_up(x, m):
    return ((x + m - 1) // m) * m


def _tpu_generation():
    try:
        kind = jax.devices()[0].device_kind.lower()  # e.g. "tpu v6e", "tpu v5 lite"
    except Exception:
        return 0
    digits = re.findall(r"\d+", kind)
    return int(digits[0]) if digits else 0


def _hw_params():
    """Return (tile_byte_target, scoped_vmem_cap_bytes, num_tensorcores)."""
    gen = _tpu_generation()
    if gen >= 7:   # v7x: 64 MiB VMEM/TC, ~3.2 TB/s HBM, 2 TensorCores
        return 8 * _MIB, 48 * _MIB, 2
    if gen == 6:   # v6e: 128 MiB VMEM, ~1.4 TB/s HBM
        return 12 * _MIB, 96 * _MIB, 1
    if gen == 5:   # v5e: 128 MiB VMEM (16 MiB scoped default), ~0.8 TB/s HBM
        return 8 * _MIB, 64 * _MIB, 1
    return 8 * _MIB, 48 * _MIB, 1  # unknown: conservative


def _sublane_align(*dtypes):
    # Sublane packing: f32 -> 8 rows, bf16 -> 16, int8/fp8 -> 32.
    align = 8
    for dt in dtypes:
        itemsize = max(1, jnp.dtype(dt).itemsize)
        align = max(align, 8 * (4 // itemsize))
    return align


def _choose_tiles(fin, fout, row_align, tile_elems, want_two_blocks):
    # Column tile: prefer the full feature_out width.  Only tile the lane axis
    # when even `row_align` full-width rows blow the element budget; then use a
    # multiple of 128 lanes.
    if row_align * fout <= tile_elems:
        block_cols = fout
    else:
        block_cols = max(128, ((tile_elems // row_align) // 128) * 128)
        block_cols = min(block_cols, fout)

    target_rows = max(1, tile_elems // block_cols)
    block_rows = max(row_align, (target_rows // row_align) * row_align)
    if block_rows >= fin:
        block_rows = fin  # full dim -> always legal

    # Megacore: only chips with 2 TensorCores benefit; split rows into two even
    # aligned halves when the whole weight would otherwise be one block.
    if want_two_blocks and fin > row_align:
        n_blocks = pl.cdiv(fin, block_rows) * pl.cdiv(fout, block_cols)
        if n_blocks < 2:
            block_rows = _round_up(pl.cdiv(fin, 2), row_align)

    return block_rows, block_cols


def _lora_kernel(scale_ref, w_ref, b_ref, a_ref, o_ref, *,
                 block_cols, a_sliced, native_dot):
    scale = scale_ref[0, 0]

    a = a_ref[...]
    if a_sliced:
        # A is fully VMEM-resident; pick this grid step's 128-aligned column slab.
        col0 = pl.multiple_of(pl.program_id(1) * block_cols, 128)
        a = a_ref[:, pl.ds(col0, block_cols)]

    if native_dot:
        # bf16 operands straight into the MXU; scale the f32 delta.
        delta = jnp.dot(b_ref[...], a, preferred_element_type=jnp.float32) * scale
    else:
        # f32 path: fold scale into the small (block_rows, rank) operand.
        b = b_ref[...].astype(jnp.float32) * scale
        delta = jnp.dot(b, a.astype(jnp.float32),
                        preferred_element_type=jnp.float32)

    o_ref[...] = (w_ref[...].astype(jnp.float32) + delta).astype(o_ref.dtype)


def lora_apply(original_weights, lora_B, lora_A, scale, *, donate_weights=False):
    """out = W + (B @ A) * scale, computed in a single fused Pallas kernel."""
    fin, fout = original_weights.shape
    rank = lora_A.shape[0]
    assert lora_B.shape == (fin, rank)
    assert lora_A.shape == (rank, fout)

    w_item = jnp.dtype(original_weights.dtype).itemsize
    b_item = jnp.dtype(lora_B.dtype).itemsize
    a_item = jnp.dtype(lora_A.dtype).itemsize

    tile_byte_target, vmem_cap, num_tc = _hw_params()
    row_align = _sublane_align(original_weights.dtype, lora_B.dtype)

    # Per-element pipelined VMEM cost: W + out double-buffered, one f32 delta
    # tile, plus an f32 upcast copy of the W tile when W is sub-32-bit.
    bytes_per_elem = 4 * w_item + 4 + (4 if w_item < 4 else 0)
    reserve = 6 * _MIB  # A/B buffers + compiler-internal scratch headroom
    max_tile_elems = max(row_align * 128, (vmem_cap - reserve) // bytes_per_elem)
    tile_elems = max(row_align * 128,
                     min(tile_byte_target // w_item, max_tile_elems))

    block_rows, block_cols = _choose_tiles(fin, fout, row_align, tile_elems,
                                           want_two_blocks=(num_tc >= 2))
    n_row_blocks = pl.cdiv(fin, block_rows)
    n_col_blocks = pl.cdiv(fout, block_cols)
    grid = (n_row_blocks, n_col_blocks)

    # lora_A: keep fully VMEM-resident when small (fetched once for the whole
    # grid instead of once per row block when there are multiple column blocks).
    a_full_bytes = rank * fout * a_item
    a_resident = (a_full_bytes <= 2 * _MIB
                  and (n_col_blocks == 1 or fout % block_cols == 0))
    a_sliced = a_resident and n_col_blocks > 1
    if a_resident:
        a_spec = pl.BlockSpec((rank, fout), lambda i, j: (0, 0))
    else:
        a_spec = pl.BlockSpec((rank, block_cols), lambda i, j: (0, j))
    # lora_B block index is constant across the innermost (column) grid axis, so
    # Pallas fetches each row block exactly once.
    b_spec = pl.BlockSpec((block_rows, rank), lambda i, j: (i, 0))

    native_dot = (jnp.dtype(lora_B.dtype) == jnp.bfloat16
                  and jnp.dtype(lora_A.dtype) == jnp.bfloat16)

    # Explicit scoped-VMEM limit from the real footprint, capped per generation.
    tile_bytes = block_rows * block_cols * w_item
    f32_tile = block_rows * block_cols * 4
    a_buf_bytes = (rank * fout if a_resident else rank * block_cols) * a_item
    footprint = 2 * (2 * tile_bytes + block_rows * rank * b_item + a_buf_bytes)
    footprint += f32_tile + (f32_tile if w_item < 4 else 0) + 2 * _MIB
    vmem_limit = int(min(vmem_cap, max(32 * _MIB, footprint)))

    cost = pl.CostEstimate(
        flops=2 * fin * fout * rank + fin * fout,
        transcendentals=0,
        bytes_accessed=(2 * fin * fout * w_item
                        + fin * rank * b_item
                        + rank * fout * a_item),
    )

    kernel = functools.partial(_lora_kernel, block_cols=block_cols,
                               a_sliced=a_sliced, native_dot=native_dot)

    # scale as a (1,1) SMEM scalar: works with traced values, no recompiles.
    scale_arr = jnp.asarray(scale, dtype=jnp.float32).reshape(1, 1)

    return pl.pallas_call(
        kernel,
        out_shape=jax.ShapeDtypeStruct((fin, fout), original_weights.dtype),
        grid_spec=pltpu.PrefetchScalarGridSpec(
            num_scalar_prefetch=0,
            grid=grid,
            in_specs=[
                pl.BlockSpec(memory_space=pltpu.MemorySpace.SMEM),            # scale
                pl.BlockSpec((block_rows, block_cols), lambda i, j: (i, j)),  # W
                b_spec,                                                       # lora_B
                a_spec,                                                       # lora_A
            ],
            out_specs=pl.BlockSpec((block_rows, block_cols), lambda i, j: (i, j)),
        ),
        compiler_params=pltpu.CompilerParams(
            dimension_semantics=("parallel", "parallel"),
            vmem_limit_bytes=vmem_limit,
        ),
        cost_estimate=cost,
        # Alias W -> out only when the caller donates W (in-place parametrization).
        input_output_aliases=({1: 0} if donate_weights else {}),
    )(scale_arr, original_weights, lora_B, lora_A)


class LoRAParametrization:
    """JAX mirror of the PyTorch LoRAParametrization module."""

    def __init__(self, features_in, features_out, rank=1, alpha=1, key=None):
        if key is None:
            key = jax.random.PRNGKey(0)
        # PyTorch: lora_A ~ Normal(0, 1) with shape (rank, features_out),
        #          lora_B = zeros with shape (features_in, rank).
        self.lora_A = jax.random.normal(key, (rank, features_out), dtype=jnp.float32)
        self.lora_B = jnp.zeros((features_in, rank), dtype=jnp.float32)
        self.scale = alpha / rank
        self.enabled = True

    def __call__(self, original_weights):
        if self.enabled:
            return lora_apply(original_weights, self.lora_B, self.lora_A, self.scale)
        return original_weights


if __name__ == "__main__":
    # Small shapes consistent with the module's forward: W is a 2-D weight
    # matrix of shape (features_in, features_out).
    features_in, features_out, rank, alpha = 32, 128, 4, 1

    key = jax.random.PRNGKey(0)
    k_w, k_a, k_b, k_w2, k_a2, k_b2, k_w3, k_a3, k_b3 = jax.random.split(key, 9)

    W = jax.random.normal(k_w, (features_in, features_out), dtype=jnp.float32)

    lora = LoRAParametrization(features_in, features_out, rank=rank, alpha=alpha, key=k_a)
    # Make lora_B nonzero so the matmul path is actually exercised
    # (the module trains B away from zero; init is zeros).
    lora.lora_B = 0.1 * jax.random.normal(k_b, (features_in, rank), dtype=jnp.float32)

    out = jax.block_until_ready(lora(W))
    ref = W + (lora.lora_B @ lora.lora_A) * lora.scale
    assert out.shape == W.shape and out.dtype == W.dtype
    assert jnp.allclose(out, ref, atol=1e-5, rtol=1e-5)

    # Disabled path.
    lora.enabled = False
    out_disabled = jax.block_until_ready(lora(W))
    assert jnp.array_equal(out_disabled, W)

    # Non-divisible rows -> exercises remainder (masked) blocks / the v7x split.
    fin2, fout2, rank2 = 200, 384, 4
    W2 = jax.random.normal(k_w2, (fin2, fout2), dtype=jnp.float32)
    A2 = jax.random.normal(k_a2, (rank2, fout2), dtype=jnp.float32)
    B2 = 0.05 * jax.random.normal(k_b2, (fin2, rank2), dtype=jnp.float32)
    out2 = jax.block_until_ready(lora_apply(W2, B2, A2, 1.0 / rank2))
    ref2 = W2 + (B2 @ A2) * (1.0 / rank2)
    assert jnp.allclose(out2, ref2, atol=1e-5, rtol=1e-5)

    # bf16 weights + bf16 LoRA factors -> exercises the native-bf16 MXU path
    # and the f32 upcast of W inside the kernel.
    fin3, fout3, rank3, scale3 = 64, 256, 4, 0.25
    W3 = jax.random.normal(k_w3, (fin3, fout3), dtype=jnp.float32).astype(jnp.bfloat16)
    A3 = jax.random.normal(k_a3, (rank3, fout3), dtype=jnp.float32).astype(jnp.bfloat16)
    B3 = (0.1 * jax.random.normal(k_b3, (fin3, rank3), dtype=jnp.float32)).astype(jnp.bfloat16)
    out3 = jax.block_until_ready(lora_apply(W3, B3, A3, scale3))
    ref3 = (W3.astype(jnp.float32)
            + (B3.astype(jnp.float32) @ A3.astype(jnp.float32)) * scale3)
    assert out3.dtype == jnp.bfloat16
    assert jnp.allclose(out3.astype(jnp.float32), ref3, atol=5e-2, rtol=5e-2)

    print("KERNEL_OK")
</pallas_src>

<mosaic_0001>
module attributes {stable_mosaic.version = 11 : i64} {
  func.func @_lora_kernel(%arg0: i32, %arg1: i32, %arg2: memref<1x1xf32, #tpu.memory_space<smem>>, %arg3: memref<32x128xf32, #tpu.memory_space<vmem>>, %arg4: memref<32x4xf32, #tpu.memory_space<vmem>>, %arg5: memref<4x128xf32, #tpu.memory_space<vmem>>, %arg6: memref<32x128xf32, #tpu.memory_space<vmem>>) attributes {dimension_semantics = [#tpu.dimension_semantics<parallel>, #tpu.dimension_semantics<parallel>], iteration_bounds = array<i64: 1, 1>, scalar_prefetch = 0 : i64, scratch_operands = 0 : i64, tpu.core_type = #tpu.core_type<tc>, window_params = [{transform_indices = @transform_0, window_bounds = array<i64: 1, 1>}, {transform_indices = @transform_1, window_bounds = array<i64: 32, 128>}, {transform_indices = @transform_2, window_bounds = array<i64: 32, 4>}, {pipeline_mode = #tpu.pipeline_mode<synchronous>, transform_indices = @transform_3, window_bounds = array<i64: 4, 128>}, {transform_indices = @transform_4, window_bounds = array<i64: 32, 128>}]} {
    %c0 = arith.constant 0 : index
    %c0_0 = arith.constant 0 : index
    %0 = memref.load %arg2[%c0, %c0_0] : memref<1x1xf32, #tpu.memory_space<smem>>
    %c0_1 = arith.constant 0 : index
    %c0_2 = arith.constant 0 : index
    %1 = vector.load %arg5[%c0_1, %c0_2] : memref<4x128xf32, #tpu.memory_space<vmem>>, vector<4x128xf32>
    %c0_3 = arith.constant 0 : index
    %c0_4 = arith.constant 0 : index
    %2 = vector.load %arg4[%c0_3, %c0_4] : memref<32x4xf32, #tpu.memory_space<vmem>>, vector<32x4xf32>
    %3 = vector.broadcast %0 : f32 to vector<32x4xf32>
    %4 = arith.mulf %2, %3 : vector<32x4xf32>
    %cst = arith.constant dense<0.000000e+00> : vector<32x128xf32>
    %5 = tpu.matmul %4, %1, %cst {dimension_numbers = #tpu.dot_dimension_numbers<[1], [0], [0], [1], [0, 0, 1, 1], [], []>} : vector<32x4xf32>, vector<4x128xf32>, vector<32x128xf32> -> vector<32x128xf32>
    %c0_5 = arith.constant 0 : index
    %c0_6 = arith.constant 0 : index
    %6 = vector.load %arg3[%c0_5, %c0_6] : memref<32x128xf32, #tpu.memory_space<vmem>>, vector<32x128xf32>
    %7 = arith.addf %6, %5 : vector<32x128xf32>
    %c0_7 = arith.constant 0 : index
    %c0_8 = arith.constant 0 : index
    %8 = vector.load %arg6[%c0_7, %c0_8] : memref<32x128xf32, #tpu.memory_space<vmem>>, vector<32x128xf32>
    tpu.vector_store %arg6[%c0_7, %c0_8], %7 {strides = array<i32>} : memref<32x128xf32, #tpu.memory_space<vmem>>, vector<32x128xf32>,
    return
  }
  func.func @transform_0(%arg0: i32, %arg1: i32) -> (i32, i32) {
    %c0_i32 = arith.constant 0 : i32
    %c0_i32_0 = arith.constant 0 : i32
    %c0_i32_1 = arith.constant 0 : i32
    return %c0_i32, %c0_i32_0 : i32, i32
  }
  func.func @transform_1(%arg0: i32, %arg1: i32) -> (i32, i32) {
    %c0_i32 = arith.constant 0 : i32
    return %arg0, %arg1 : i32, i32
  }
  func.func @transform_2(%arg0: i32, %arg1: i32) -> (i32, i32) {
    %c0_i32 = arith.constant 0 : i32
    %c0_i32_0 = arith.constant 0 : i32
    return %arg0, %c0_i32 : i32, i32
  }
  func.func @transform_3(%arg0: i32, %arg1: i32) -> (i32, i32) {
    %c0_i32 = arith.constant 0 : i32
    %c0_i32_0 = arith.constant 0 : i32
    %c0_i32_1 = arith.constant 0 : i32
    return %c0_i32, %c0_i32_0 : i32, i32
  }
  func.func @transform_4(%arg0: i32, %arg1: i32) -> (i32, i32) {
    %c0_i32 = arith.constant 0 : i32
    return %arg0, %arg1 : i32, i32
  }
}

</mosaic_0001>

<bundles_post_ra>
// kernel: tpu_custom_call.1
= control target key start
LH: loop header
LB: loop body
LE: loop exit
PB: predicated region body
PF: predicated region fallthrough
CT: control target
= control target key end

     0   :  { %vm43_vm0 = vcmask 1043456   ;;  %vm30_vm1 = vcmask 31744   ;;  %s281_s0 = inlined_call_operand.<no memory space> [shape: f32[1,1], index: 0, kind: input, shape index: {}]   ;;  %s282_s1 = inlined_call_operand.vmem [shape: f32[32,128], index: 1, kind: input, shape index: {}]   ;;  %s283_s2 = inlined_call_operand.vmem [shape: f32[32,4], index: 2, kind: input, shape index: {}]   ;;  %s284_s3 = inlined_call_operand.vmem [shape: f32[4,128], index: 3, kind: input, shape index: {}]   ;;  %s285_s4 = inlined_call_operand.hbm [shape: f32[32,128], index: 4, kind: output, shape index: {}]  }
   0x1   :  { %v20_v0 = vld [vmem:[%s284_s3] sm:$0xf]  ;;  %v25_v2 = vstv %s281_s0  ;;  %v23_v3 = vld [vmem:[%s283_s2 + $0x10] sm:$0xff]  ;;  %v22_v6 = vld [vmem:[%s283_s2 + $0x8] sm:$0xff] }
   0x2   :  { %v21_v1 = vld [vmem:[%s283_s2] sm:$0xff]  ;;  %170 = vmatprep.subr.msk.mxu0 %vm43_vm0, %v20_v0  ;;  %178 = vmatprep.subr.msk.mxu1 %vm43_vm0, %v20_v0  ;;  %v28_v5 = vmul.f32 %v25_v2, %v23_v3  ;;  %v24_v7 = vld [vmem:[%s283_s2 + $0x18] sm:$0xff] }
   0x3   :  { %v26_v4 = vmul.f32 %v25_v2, %v21_v1 }
   0x4   :  { %10 = vsyncpa [#allocation4], 0  ;;  %171 = vmatpush3.msk.msra.mxu0 %vm43_vm0, %v20_v0  ;;  %179 = vmatpush3.msk.msra.mxu1 %vm43_vm0, %v20_v0  ;;  %v27_v8 = vmul.f32 %v25_v2, %v22_v6  ;;  %v29_v9 = vmul.f32 %v25_v2, %v24_v7  ;;  %v133_v10 = vld [vmem:[%s282_s1 + $0x8] sm:$0xff]  ;;  %v135_v11 = vld [vmem:[%s282_s1 + $0x18] sm:$0xff]  ;;  %s207_s2 = smov [#allocation3]  }
   0x5   :  { %172 = vmatprep.mubr.msk.f32.mxu0 %vm30_vm1, %v26_v4  ;;  %175 = vmatprep.mubr.msk.f32.mxu1 %vm30_vm1, %v28_v5  ;;  %s149_s29 = sshll.u32 %s207_s2, 4  ;;  %v132_v12 = vld [vmem:[%s282_s1] sm:$0xff]  ;;  %v134_v13 = vld [vmem:[%s282_s1 + $0x10] sm:$0xff]  ;;  %s150_s29 = int_to_ptr.vmem [resolvable:$true] %s149_s29 }
   0x6   :  { %173 = vmatmul.mubr.msk.f32.vlgmr.msra.gmra.mrb[0].mxu0 %vm30_vm1, %v27_v8  ;;  %176 = vmatmul.mubr.msk.f32.vlgmr.msra.gmra.mrb[0].mxu1 %vm30_vm1, %v29_v9  ;;  %s183_s8 = scalar_lea.vmem %s150_s29, 512  ;;  %p188_p1 = scmp.lt.s32.totalorder %s150_s29, %s150_s29 }
   0x7   :  { %p184_p0 = scmp.ne.s32.totalorder %s150_s29, %s183_s8  ;;  %p189_p2 = scmp.lt.s32.totalorder %s183_s8, %s183_s8 }
   0x9   :  { %p190_p3 = por %p189_p2, %p188_p1 }
   0xb   :  { %p191_p4 = pnand %p190_p3, %p184_p0 }
  0xd9   :  { %v174_v14 = vpop.f32.mrb[0].mxu0  ;;  %v177_v15 = vpop.f32.mrb[0].mxu1 }
  0xda   :  { %v137_v16 = vadd.f32 %v174_v14, %v133_v10  ;;  %v139_v17 = vadd.f32 %v177_v15, %v135_v11  ;;  %v113_v18 = vpop.f32.mrb[1].mxu0  ;;  %v123_v19 = vpop.f32.mrb[1].mxu1 }
  0xdb   :  { %v136_v20 = vadd.f32 %v132_v12, %v113_v18  ;;  %v138_v21 = vadd.f32 %v134_v13, %v123_v19 }
  0xdc   :  { %141 = vst [vmem:[#allocation3 + $0x8] sm:$0xff] %v137_v16  ;;  %143 = vst [vmem:[#allocation3 + $0x18] sm:$0xff] %v139_v17 }
  0xdd   :  { %140 = vst [vmem:[#allocation3] sm:$0xff] %v136_v20  ;;  %142 = vst [vmem:[#allocation3 + $0x10] sm:$0xff] %v138_v21 }
  0xde   :  { %194 = shalt.err (!%p191_p4)
}
  0xdf   :  { %s195_s10 = scalar_lea.hbm %s285_s4, 512 }
  0xe0   :  { %p196_p5 = scmp.ne.s32.totalorder %s285_s4, %s195_s10  ;;  %p199_p6 = scmp.lt.u32.totalorder %s195_s10, %s285_s4 }
  0xe2   :  { %p201_p7 = pnand %p199_p6, %p196_p5 }
  0xe4   :  { %204 = shalt.err (!%p201_p7)
}
  0xe5   :  { %s208_s15 = smov 128   ;;  %s209_s16 = smov 8  }
  0xe6   :  { %155 = dma.vmem_to_hbm [thread:$0]  %s150_s29, 512, %s285_s4, [#allocation4], %s208_s15, %s208_s15, %s209_s16  }
  0xe7   :  { %205 = dma.done.wait [#allocation4], 512  }
  0xe8   :  { %206 = vsyncadd [#allocation4], 4294966784 }
  0xe9   :  { %159 = vsyncpa [#allocation4], 1 }

</bundles_post_ra>
